<compile_context>
chip_gen: v5e
topology: v5e:2x2
jax: 0.10.0
libtpu: 0.0.40
codegen_flags: <defaults>
</compile_context>

<pallas_src>
import math

import jax
import jax.numpy as jnp
from jax.experimental import pallas as pl
from jax.experimental.pallas import tpu as pltpu


def _ia3_kernel(x_ref, lam_ref, o_ref):
    # x_ref: (tile_rows, lane), lam_ref: (1, lane) -> broadcast multiply on VPU.
    o_ref[...] = (x_ref[...] * lam_ref[...]).astype(o_ref.dtype)


def _sublane_mult(dt):
    # Second-to-last block dim alignment per dtype packing.
    return {1: 32, 2: 16, 4: 8}.get(jnp.dtype(dt).itemsize, 8)


def _chip_budgets():
    """Return (target_block_bytes, vmem_limit_bytes, force_two_blocks)."""
    try:
        vmem_cap = int(pltpu.get_tpu_info().vmem_capacity_bytes)
    except Exception:
        vmem_cap = 64 * 1024 * 1024  # conservative: assume v7x-class VMEM
    if vmem_cap <= 64 * 1024 * 1024:
        # v7x: 64 MiB VMEM, 2 TensorCores. 8 MiB blocks -> ~32 MiB of buffers.
        return 8 * 1024 * 1024, 40 * 1024 * 1024, True
    # v5e / v6e: 128 MiB VMEM, single TC -> bigger blocks amortize the
    # ~0.35 us per-grid-step overhead further.
    return 14 * 1024 * 1024, 72 * 1024 * 1024, False


def ia3_forward(x, lambda_param, *, target_block_bytes=None):
    """IA3 forward: x * lambda_param, x shape (..., dim), lambda shape (dim,)."""
    dim = lambda_param.shape[0]
    assert x.shape[-1] == dim, "last axis of x must equal dim"
    orig_shape = x.shape

    # PyTorch promotion semantics: output dtype = result_type(x, lambda).
    out_dtype = jnp.result_type(x.dtype, lambda_param.dtype)
    lam = lambda_param.astype(out_dtype)

    rows = 1
    for s in orig_shape[:-1]:
        rows *= s
    if rows == 0 or dim == 0:
        return (x.astype(out_dtype) * lam).reshape(orig_shape)

    block_bytes, vmem_limit, force_two_blocks = _chip_budgets()
    if target_block_bytes is not None:
        block_bytes = int(target_block_bytes)

    itemsize = max(jnp.dtype(x.dtype).itemsize, jnp.dtype(out_dtype).itemsize)
    sublane = max(_sublane_mult(x.dtype), _sublane_mult(out_dtype))

    # --- lane-dense layout: fold R rows so lane width R*dim is a 128-multiple ---
    R = 128 // math.gcd(dim, 128)
    # Guard against lane blow-up (odd dim -> R up to 128): the minimum
    # sublane-high block must still fit the per-block budget.
    fold_ok = sublane * (R * dim) * itemsize <= block_bytes
    pad_rows = 0
    if fold_ok:
        pad_rows = (-rows) % R          # pad a few rows instead of masked stores
        x2d = x.reshape(rows, dim)
        if pad_rows:
            x2d = jnp.pad(x2d, ((0, pad_rows), (0, 0)))
        rows_p = rows + pad_rows
        rows2 = rows_p // R
        lane = R * dim
        x2d = x2d.reshape(rows2, lane)
        lam_wide = jnp.tile(lam, (R,)) if R > 1 else lam
    else:
        # Fallback: keep (rows, dim); full-extent last-dim block is legal
        # (masked stores, but avoids VMEM OOM for huge odd dims).
        rows2, lane = rows, dim
        x2d = x.reshape(rows2, lane)
        lam_wide = lam
    lam2d = lam_wide.reshape(1, lane)

    # --- row tile sized by the VMEM budget, sublane aligned ---
    tr = block_bytes // (lane * itemsize)
    tr = max(sublane, (tr // sublane) * sublane)
    if force_two_blocks and rows2 > sublane:
        # v7x: guarantee >= 2 grid blocks so both TensorCores get work.
        half = ((pl.cdiv(rows2, 2) + sublane - 1) // sublane) * sublane
        tr = min(tr, half)
    if tr >= rows2:
        tr = rows2                       # single block covering full row extent
    n_blocks = pl.cdiv(rows2, tr)        # ragged last block masked by Pallas

    out = pl.pallas_call(
        _ia3_kernel,
        out_shape=jax.ShapeDtypeStruct((rows2, lane), out_dtype),
        grid_spec=pltpu.PrefetchScalarGridSpec(
            num_scalar_prefetch=0,
            grid=(n_blocks,),
            in_specs=[
                pl.BlockSpec((tr, lane), lambda i: (i, 0)),
                pl.BlockSpec((1, lane), lambda i: (0, 0)),
            ],
            out_specs=pl.BlockSpec((tr, lane), lambda i: (i, 0)),
        ),
        compiler_params=pltpu.CompilerParams(
            dimension_semantics=("parallel",),
            vmem_limit_bytes=vmem_limit,
        ),
    )(x2d, lam2d)

    if pad_rows:
        out = out.reshape(rows + pad_rows, dim)[:rows]
    return out.reshape(orig_shape)


if __name__ == "__main__":
    key = jax.random.PRNGKey(0)
    batch, seq, hidden = 2, 8, 32

    # Deterministic parameter init matching nn.Parameter(torch.ones(dim))
    lambda_param = jnp.ones((hidden,), dtype=jnp.float32)

    x = jax.random.normal(key, (batch, seq, hidden), dtype=jnp.float32)

    y = ia3_forward(x, lambda_param)
    y = jax.block_until_ready(y)

    # Reference check (same semantics as the PyTorch module)
    y_ref = x * lambda_param
    assert y.shape == x.shape
    assert y.dtype == y_ref.dtype
    assert jnp.allclose(y, y_ref, atol=1e-6, rtol=1e-6)

    print("KERNEL_OK")
</pallas_src>

<mosaic_0001>
module attributes {stable_mosaic.version = 11 : i64} {
  func.func @_ia3_kernel(%arg0: i32, %arg1: memref<4x128xf32, #tpu.memory_space<vmem>>, %arg2: memref<1x128xf32, #tpu.memory_space<vmem>>, %arg3: memref<4x128xf32, #tpu.memory_space<vmem>>) attributes {dimension_semantics = [#tpu.dimension_semantics<parallel>], iteration_bounds = array<i64: 1>, scalar_prefetch = 0 : i64, scratch_operands = 0 : i64, tpu.core_type = #tpu.core_type<tc>, window_params = [{transform_indices = @transform_0, window_bounds = array<i64: 4, 128>}, {pipeline_mode = #tpu.pipeline_mode<synchronous>, transform_indices = @transform_1, window_bounds = array<i64: 1, 128>}, {transform_indices = @transform_2, window_bounds = array<i64: 4, 128>}]} {
    %c0 = arith.constant 0 : index
    %c0_0 = arith.constant 0 : index
    %0 = vector.load %arg1[%c0, %c0_0] : memref<4x128xf32, #tpu.memory_space<vmem>>, vector<4x128xf32>
    %c0_1 = arith.constant 0 : index
    %c0_2 = arith.constant 0 : index
    %1 = vector.load %arg2[%c0_1, %c0_2] : memref<1x128xf32, #tpu.memory_space<vmem>>, vector<1x128xf32>
    %2 = vector.broadcast %1 : vector<1x128xf32> to vector<4x128xf32>
    %3 = arith.mulf %0, %2 : vector<4x128xf32>
    %c0_3 = arith.constant 0 : index
    %c0_4 = arith.constant 0 : index
    %4 = vector.load %arg3[%c0_3, %c0_4] : memref<4x128xf32, #tpu.memory_space<vmem>>, vector<4x128xf32>
    tpu.vector_store %arg3[%c0_3, %c0_4], %3 {strides = array<i32>} : memref<4x128xf32, #tpu.memory_space<vmem>>, vector<4x128xf32>,
    return
  }
  func.func @transform_0(%arg0: i32) -> (i32, i32) {
    %c0_i32 = arith.constant 0 : i32
    %c0_i32_0 = arith.constant 0 : i32
    return %arg0, %c0_i32 : i32, i32
  }
  func.func @transform_1(%arg0: i32) -> (i32, i32) {
    %c0_i32 = arith.constant 0 : i32
    %c0_i32_0 = arith.constant 0 : i32
    %c0_i32_1 = arith.constant 0 : i32
    return %c0_i32, %c0_i32_0 : i32, i32
  }
  func.func @transform_2(%arg0: i32) -> (i32, i32) {
    %c0_i32 = arith.constant 0 : i32
    %c0_i32_0 = arith.constant 0 : i32
    return %arg0, %c0_i32 : i32, i32
  }
}

</mosaic_0001>

<bundles_post_ra>
// kernel: tpu_custom_call.1
= control target key start
LH: loop header
LB: loop body
LE: loop exit
PB: predicated region body
PF: predicated region fallthrough
CT: control target
= control target key end

     0   :  { %7 = vsyncpa [#allocation3], 0  ;;  %s174_s0 = inlined_call_operand.hbm [shape: f32[4,128], index: 0, kind: input, shape index: {}]   ;;  %s175_s1 = inlined_call_operand.hbm [shape: f32[1,128], index: 1, kind: input, shape index: {}]   ;;  %s176_s2 = inlined_call_operand.hbm [shape: f32[4,128], index: 2, kind: output, shape index: {}]  }
   0x1   :  { %8 = vsyncpa [#allocation6], 0 }
   0x2   :  { %9 = vsyncpa [#allocation4], 0  ;;  %s15_s11 = sshll.u32 %s174_s0, 4  ;;  %s147_s12 = smov [#allocation2]   ;;  %s16_s11 = int_to_ptr.hbm [resolvable:$true] %s15_s11 }
   0x3   :  { %s17_s13 = sshll.u32 %s147_s12, 4  ;;  %s26_s16 = sshll.u32 %s175_s1, 4  ;;  %s18_s13 = int_to_ptr.vmem [resolvable:$true] %s17_s13  ;;  %s27_s16 = int_to_ptr.hbm [resolvable:$true] %s26_s16 }
   0x4   :  { %20 = dma.hbm_to_vmem [thread:$0]  %s16_s11, 64, %s18_s13, [#allocation3]  }
   0x5   :  { %s148_s17 = smov [#allocation5]  }
   0x6   :  { %s28_s18 = sshll.u32 %s148_s17, 4  ;;  %s29_s18 = int_to_ptr.vmem [resolvable:$true] %s28_s18 }
   0x7   :  { %31 = dma.hbm_to_vmem [thread:$0]  %s27_s16, 16, %s29_s18, [#allocation6]  }
   0x8   :  { %141 = dma.done.wait [#allocation3], 64  }
   0x9   :  { %142 = vsyncadd [#allocation3], 4294967232 }
   0xa   :  { %143 = dma.done.wait [#allocation6], 16  }
   0xb   :  { %144 = vsyncadd [#allocation6], 4294967280  ;;  %s149_s19 = smov [#allocation7]   ;;  %s54_s22 = sshll.u32 %s176_s2, 4  ;;  %v40_v0 = vld [vmem:[#allocation2] sm:$0xf]  ;;  %s55_s22 = int_to_ptr.hbm [resolvable:$true] %s54_s22 }
   0xc   :  { %s52_s0 = sshll.u32 %s149_s19, 4  ;;  %v68_v1 = vld [vmem:[#allocation5] ss:$0 sm:$0xff]  ;;  %s53_s0 = int_to_ptr.vmem [resolvable:$true] %s52_s0 }
   0xd   :  { %v45_v2 = vmul.f32 %v68_v1, %v40_v0 }
   0xf   :  { %46 = vst [vmem:[#allocation7] sm:$0xf] %v45_v2 }
  0x10   :  { %57 = dma.vmem_to_hbm [thread:$0]  %s53_s0, 64, %s55_s22, [#allocation4]  }
  0x11   :  { %145 = dma.done.wait [#allocation4], 64  }
  0x12   :  { %146 = vsyncadd [#allocation4], 4294967232 }
  0x13   :  { %62 = vsyncpa [#allocation3], 1 }
  0x14   :  { %63 = vsyncpa [#allocation6], 1 }
  0x15   :  { %64 = vsyncpa [#allocation4], 1 }

</bundles_post_ra>
